<compile_context>
chip_gen: v5e
topology: v5e:2x2
jax: 0.10.0
libtpu: 0.0.40
codegen_flags: <defaults>
</compile_context>

<pallas_src>
import functools

import jax
import jax.numpy as jnp
from jax.experimental import pallas as pl
from jax.experimental.pallas import tpu as pltpu


def _gem_kernel(p_ref, x_ref, o_ref, acc_ref, *, eps: float, spatial_size: int,
                spatial_tile: int, needs_mask: bool):
    # p_ref:   (1,) float32 in SMEM (the learnable exponent)
    # x_ref:   (TB, TC, TS) block in VMEM
    # o_ref:   (TB, TC) output block
    # acc_ref: (TB, TC) f32 running-sum scratch (persists across the reduction axis)
    s_idx = pl.program_id(2)

    @pl.when(s_idx == 0)
    def _():
        acc_ref[...] = jnp.zeros_like(acc_ref)

    p = p_ref[0]
    x = x_ref[...].astype(jnp.float32)

    # clamp(min=eps) then x ** p.  Values are >= eps > 0 after the clamp, so exp/log is
    # exact and matches torch's pow for a dynamic, non-integer exponent.
    xc = jnp.maximum(x, eps)
    xp = jnp.exp(p * jnp.log(xc))

    if needs_mask:
        # Zero out padded lanes of a non-dividing last spatial tile so they do not
        # contribute to the running sum.
        lane = jax.lax.broadcasted_iota(jnp.int32, xp.shape, 2)
        valid = (s_idx * spatial_tile + lane) < spatial_size
        xp = jnp.where(valid, xp, 0.0)

    # Raw sum per (b, c); the 1/(H*W) and 1/p are folded into the finalize step.
    acc_ref[...] += jnp.sum(xp, axis=-1)

    @pl.when(s_idx == pl.num_programs(2) - 1)
    def _():
        mean = acc_ref[...] * (1.0 / float(spatial_size))
        o_ref[...] = jnp.exp(jnp.log(mean) / p).astype(o_ref.dtype)


def image_gem(x: jax.Array, p: jax.Array, eps: float = 1e-6, *,
              spatial_tile: int | None = None) -> jax.Array:
    """x: (B, C, H, W) NCHW, p: (1,) float32.  Returns (B, C)."""
    assert x.ndim == 4
    B, C, H, W = x.shape
    S = H * W

    # Free layout change: NCHW -> (B, C, H*W); no HBM transpose, H*W lands on the lane axis.
    xr = x.reshape(B, C, S)

    # ---- tile selection (keeps 2 x tile x 4B well under scoped-VMEM on all generations) ----
    # Batch tile: leading dim of the input block (unconstrained) but sublane of the output
    # block, so it must be a multiple of 8 or the full extent.
    TB = B if B <= 8 else 8
    # Channel tile: sublane of the input block (mult of 8 or full) AND lane of the output
    # block (mult of 128 or full).
    TC = C if C <= 128 else 128
    # Spatial tile: lane of the input block (mult of 128 or full).
    if spatial_tile is None:
        TS = S if S <= 1024 else 1024
    else:
        if spatial_tile >= S or S <= 128:
            TS = S
        else:
            TS = max(128, (spatial_tile // 128) * 128)
    needs_mask = (S % TS) != 0

    grid = (pl.cdiv(B, TB), pl.cdiv(C, TC), pl.cdiv(S, TS))

    out = pl.pallas_call(
        functools.partial(
            _gem_kernel,
            eps=eps,
            spatial_size=S,
            spatial_tile=TS,
            needs_mask=needs_mask,
        ),
        out_shape=jax.ShapeDtypeStruct((B, C), x.dtype),
        grid=grid,
        in_specs=[
            pl.BlockSpec(memory_space=pltpu.SMEM),                  # p: whole (1,) in SMEM
            pl.BlockSpec((TB, TC, TS), lambda b, c, s: (b, c, s)),  # input tile
        ],
        out_specs=pl.BlockSpec((TB, TC), lambda b, c, s: (b, c)),   # resident across s
        scratch_shapes=[pltpu.VMEM((TB, TC), jnp.float32)],
        compiler_params=pltpu.CompilerParams(
            dimension_semantics=("parallel", "parallel", "arbitrary"),
        ),
    )(p.astype(jnp.float32), xr)
    return out


def image_gem_ref(x: jax.Array, p: jax.Array, eps: float = 1e-6) -> jax.Array:
    """Pure-JAX reference matching the PyTorch module."""
    pv = p[0]
    pooled = jnp.mean(jnp.maximum(x, eps) ** pv, axis=(-2, -1))  # (B, C)
    return pooled ** (1.0 / pv)


if __name__ == "__main__":
    key = jax.random.PRNGKey(0)

    # Deterministic parameter init, same as nn.Parameter(torch.ones(1) * 3)
    p = jnp.ones((1,), dtype=jnp.float32) * 3.0
    eps = 1e-6

    # Case 1: primary shape; force spatial_tile=128 so the accumulation path
    # (2 reduction steps over H*W=256) is exercised.
    B, C, H, W = 2, 4, 16, 16
    x = jax.random.normal(key, (B, C, H, W), dtype=jnp.float32)
    out = jax.block_until_ready(image_gem(x, p, eps, spatial_tile=128))
    ref = image_gem_ref(x, p, eps)
    assert out.shape == (B, C), out.shape
    assert jnp.allclose(out, ref, rtol=1e-5, atol=1e-5), (out, ref)

    # Case 2: non-dividing spatial extent (H*W=144, tile=128) to exercise the masked tail.
    x2 = jax.random.normal(jax.random.PRNGKey(1), (2, 4, 12, 12), dtype=jnp.float32)
    out2 = jax.block_until_ready(image_gem(x2, p, eps, spatial_tile=128))
    ref2 = image_gem_ref(x2, p, eps)
    assert jnp.allclose(out2, ref2, rtol=1e-5, atol=1e-5), (out2, ref2)

    print("KERNEL_OK")
</pallas_src>

<mosaic_0001>
module attributes {stable_mosaic.version = 11 : i64} {
  func.func @_gem_kernel(%arg0: i32, %arg1: i32, %arg2: i32, %arg3: memref<1xf32, #tpu.memory_space<smem>>, %arg4: memref<2x4x128xf32, #tpu.memory_space<vmem>>, %arg5: memref<2x4xf32, #tpu.memory_space<vmem>>, %arg6: memref<2x4xf32, #tpu.memory_space<vmem>>) attributes {dimension_semantics = [#tpu.dimension_semantics<parallel>, #tpu.dimension_semantics<parallel>, #tpu.dimension_semantics<arbitrary>], iteration_bounds = array<i64: 1, 1, 2>, scalar_prefetch = 0 : i64, scratch_operands = 1 : i64, tpu.core_type = #tpu.core_type<tc>, window_params = [{transform_indices = @transform_0, window_bounds = array<i64: 1>}, {transform_indices = @transform_1, window_bounds = array<i64: 2, 4, 128>}, {transform_indices = @transform_2, window_bounds = array<i64: 2, 4>}]} {
    %c0_i32 = arith.constant 0 : i32
    %0 = arith.cmpi eq, %arg2, %c0_i32 : i32
    %1 = arith.extui %0 : i1 to i32
    %c0_i32_0 = arith.constant 0 : i32
    %2 = arith.cmpi ne, %1, %c0_i32_0 : i32
    scf.if %2 {
      %cst_10 = arith.constant 0.000000e+00 : f32
      %18 = vector.broadcast %cst_10 : f32 to vector<2x4xf32>
      %c0_11 = arith.constant 0 : index
      %c0_12 = arith.constant 0 : index
      %19 = vector.load %arg6[%c0_11, %c0_12] : memref<2x4xf32, #tpu.memory_space<vmem>>, vector<2x4xf32>
      tpu.vector_store %arg6[%c0_11, %c0_12], %18 {strides = array<i32>} : memref<2x4xf32, #tpu.memory_space<vmem>>, vector<2x4xf32>,
    } else {
    }
    %c0 = arith.constant 0 : index
    %3 = memref.load %arg3[%c0] : memref<1xf32, #tpu.memory_space<smem>>
    %c0_1 = arith.constant 0 : index
    %c0_2 = arith.constant 0 : index
    %c0_3 = arith.constant 0 : index
    %4 = vector.load %arg4[%c0_1, %c0_2, %c0_3] : memref<2x4x128xf32, #tpu.memory_space<vmem>>, vector<2x4x128xf32>
    %cst = arith.constant 9.99999997E-7 : f32
    %5 = vector.broadcast %cst : f32 to vector<2x4x128xf32>
    %6 = arith.maximumf %4, %5 : vector<2x4x128xf32>
    %7 = math.log %6 : vector<2x4x128xf32>
    %8 = vector.broadcast %3 : f32 to vector<2x4x128xf32>
    %9 = arith.mulf %8, %7 : vector<2x4x128xf32>
    %10 = math.exp %9 : vector<2x4x128xf32>
    %c0_4 = arith.constant 0 : index
    %c0_5 = arith.constant 0 : index
    %11 = vector.load %arg6[%c0_4, %c0_5] : memref<2x4xf32, #tpu.memory_space<vmem>>, vector<2x4xf32>
    %cst_6 = arith.constant dense<0.000000e+00> : vector<2x4xf32>
    %12 = vector.multi_reduction <add>, %10, %cst_6 [2] : vector<2x4x128xf32> to vector<2x4xf32>
    %13 = arith.addf %11, %12 : vector<2x4xf32>
    %c0_7 = arith.constant 0 : index
    %c0_8 = arith.constant 0 : index
    %14 = vector.load %arg6[%c0_7, %c0_8] : memref<2x4xf32, #tpu.memory_space<vmem>>, vector<2x4xf32>
    tpu.vector_store %arg6[%c0_7, %c0_8], %13 {strides = array<i32>} : memref<2x4xf32, #tpu.memory_space<vmem>>, vector<2x4xf32>,
    %c1_i32 = arith.constant 1 : i32
    %15 = arith.cmpi eq, %arg2, %c1_i32 : i32
    %16 = arith.extui %15 : i1 to i32
    %c0_i32_9 = arith.constant 0 : i32
    %17 = arith.cmpi ne, %16, %c0_i32_9 : i32
    scf.if %17 {
      %c0_10 = arith.constant 0 : index
      %c0_11 = arith.constant 0 : index
      %18 = vector.load %arg6[%c0_10, %c0_11] : memref<2x4xf32, #tpu.memory_space<vmem>>, vector<2x4xf32>
      %cst_12 = arith.constant 3.906250e-03 : f32
      %19 = vector.broadcast %cst_12 : f32 to vector<2x4xf32>
      %20 = arith.mulf %18, %19 : vector<2x4xf32>
      %21 = math.log %20 : vector<2x4xf32>
      %22 = vector.broadcast %3 : f32 to vector<2x4xf32>
      %23 = arith.divf %21, %22 : vector<2x4xf32>
      %24 = math.exp %23 : vector<2x4xf32>
      %c0_13 = arith.constant 0 : index
      %c0_14 = arith.constant 0 : index
      %25 = vector.load %arg5[%c0_13, %c0_14] : memref<2x4xf32, #tpu.memory_space<vmem>>, vector<2x4xf32>
      tpu.vector_store %arg5[%c0_13, %c0_14], %24 {strides = array<i32>} : memref<2x4xf32, #tpu.memory_space<vmem>>, vector<2x4xf32>,
    } else {
    }
    return
  }
  func.func @transform_0(%arg0: i32, %arg1: i32, %arg2: i32) -> i32 {
    %c0_i32 = arith.constant 0 : i32
    %c0_i32_0 = arith.constant 0 : i32
    return %c0_i32 : i32
  }
  func.func @transform_1(%arg0: i32, %arg1: i32, %arg2: i32) -> (i32, i32, i32) {
    %c0_i32 = arith.constant 0 : i32
    return %arg0, %arg1, %arg2 : i32, i32, i32
  }
  func.func @transform_2(%arg0: i32, %arg1: i32, %arg2: i32) -> (i32, i32) {
    %c0_i32 = arith.constant 0 : i32
    return %arg0, %arg1 : i32, i32
  }
}

</mosaic_0001>

<bundles_post_ra>
// kernel: tpu_custom_call.1
= control target key start
LH: loop header
LB: loop body
LE: loop exit
PB: predicated region body
PF: predicated region fallthrough
CT: control target
= control target key end

     0   :  { %s661_s0 = inlined_call_operand.<no memory space> [shape: f32[1], index: 0, kind: input, shape index: {}]   ;;  %s662_s1 = inlined_call_operand.hbm [shape: f32[2,4,256], index: 1, kind: input, shape index: {}]   ;;  %s663_s2 = inlined_call_operand.hbm [shape: f32[2,4], index: 2, kind: output, shape index: {}]  }
   0x1   :  { %7 = sst [smem:[#allocation3]] %s661_s0 }
   0x2   :  { %8 = vsyncpa [#allocation5], 0 }
   0x3   :  { %10 = vsyncpa [#allocation5 + $0x1], 0 }
   0x4   :  { %11 = vsyncpa [#allocation6], 0  ;;  %s567_s11 = smov 0   ;;  %s569_s12 = smov 0  }
   0x5   :  { %s571_s13 = smov 0   ;;  %s573_s14 = smov 0  }
   0x6   :  { %s575_s15 = smov 0   ;;  %s577_s16 = smov 0  }
   0x7 LB: > { %s337_s0 = sadd.s32 4294967295, %s542_s16   ;;  %s29_s17 = sadd.s32 1, %s538_s15  ;;  %s542_s16 = sphi %s577_s16, %s17_s16   ;;  %s538_s15 = sphi %s575_s15, %s670_s15   ;;  %s534_s14 = sphi %s573_s14, %s669_s14   ;;  %s530_s13 = sphi %s571_s13, %s668_s13   ;;  %s526_s12 = sphi %s569_s12, %s667_s12   ;;  %s522_s11 = sphi %s567_s11, %s666_s11  }
   0x8   : > { %p30_p0 = scmp.ge.s32.totalorder %s29_s17, 2  ;;  %s68_s18 = sadd.s32 1, %s530_s13 }
   0x9   : > { %p75_p1 = scmp.ne.s32.totalorder %s530_s13, %s526_s12  ;;  %p76_p2 = scmp.eq.s32.totalorder %s542_s16, 0 }
   0xa   : > { %s672_s17 = smov (%p30_p0, %s29_s17), 0  ;;  %p81_p4 = scmp.ne.s32.totalorder %s526_s12, %s522_s11 }
   0xb   : > { %p603_p3 = por %p76_p2, %p75_p1  ;;  %s64_s20 = ssub.s32 %s538_s15, %s672_s17 }
   0xc   : > { %p82_p5 = scmp.eq.s32.totalorder %s337_s0, 0  ;;  %p66_p6 = scmp.eq.s32.totalorder %s64_s20, 0 }
   0xd   : > { %p360_p8 = scmp.lt.s32.totalorder %s542_s16, 2  ;;  %s136_s23 = sand.u32 1, %s530_s13  }
   0xe   : > { %p612_p7 = por %p82_p5, %p81_p4  ;;  %s341_s24 = sshll.u32 %s538_s15, 2 }
   0xf   : > { %s618_s22 = scalar_select %p66_p6, %s530_s13, %s68_s18  }
  0x10   : > { %s340_s25 = sshll.u32 %s136_s23, 3  ;;  %s149_s28 = scalar_lea.hbm %s662_s1, %s341_s24 }
  0x11   : > { %s150_s29 = sshll.u32 %s149_s28, 4  ;;  %s140_s30 = scalar_lea.vmem [#allocation4], %s340_s25  ;;  %s151_s29 = int_to_ptr.hbm [resolvable:$true] %s150_s29 }
  0x12   : > { %s152_s3 = sshll.u32 %s140_s30, 4  ;;  %p357_p9 = pnand %p360_p8, %p603_p3  ;;  %s153_s3 = int_to_ptr.vmem [resolvable:$true] %s152_s3 }
  0x13   : > { %p342_p10 = scmp.ge.s32.totalorder %s542_s16, 1  ;;  %s137_s4 = scalar_lea.sflag [#allocation5], %s136_s23 }
  0x14   : > { %s544_s5 = smov 128   ;;  %s545_s6 = smov 64  }
  0x15   : > { %s546_s7 = smov 4   ;;  %p160_p11 = scmp.lt.s32.totalorder %s542_s16, 3 }
  0x16   : > { %359 = dma.hbm_to_vmem [thread:$0]  (!%p357_p9), %s151_s29, 128, %s153_s3, %s137_s4, %s544_s5, %s545_s6, %s546_s7  }
  0x17   : > { %p161_p12 = pnand %p342_p10, %p160_p11 }
  0x18   : > { %s166_s8 = sand.u32 (!%p161_p12), 1, %s526_s12  }
  0x19   : > { %164 = sbr.rel (%p161_p12) target bundleno = 230 (0xe6), region = 28  ;;  %s343_s9 = sshll.u32 (!%p161_p12), %s166_s8, 3 }
  0x1a   : > { %s167_s10 = scalar_lea.sflag (!%p161_p12), [#allocation5], %s166_s8  ;;  %s170_s11 = scalar_lea.vmem (!%p161_p12), [#allocation4], %s343_s9 }
  0x1e   : > { %513 = dma.done.wait (%p612_p7), %s167_s10, 128  }
  0x1f   : > { %515 = vsyncadd (%p612_p7), %s167_s10, 4294967168  ;;  %p344_p13 = scmp.ne.s32.totalorder %s534_s14, 0 }
  0x21   : > { %191 = sbr.rel (%p344_p13) target bundleno = 40 (0x28), region = 36 }
  0x26   : > { %vm192_vm0 = vcmask 25600   ;;  %v547_v0 = vmov 0.0  }
  0x27   : > { %193 = vst.msk [vmem:[#allocation2] sm:$0x3] %vm192_vm0, %v547_v0 }
  0x28 PF: > { %v195_v1 = vld [vmem:[%s170_s11] sm:$0xf]  ;;  %s194_s18 = sld [smem:[#allocation3]]  ;;  %v196_v3 = vld [vmem:[%s170_s11 + $0x4] sm:$0xf]  ;;  %vm211_vm1 = vcmask 1043456   ;;  %v220_v19 = vlaneseq }
  0x29   : > { %v197_v2 = vmax.f32 %v195_v1, 1e-06  ;;  %v198_v4 = vmax.f32 %v196_v3, 1e-06  ;;  %vm224_vm2 = vcmask 1041409   ;;  %vm228_vm3 = vcmask 25600  }
  0x2a   : > { %v221_v20 = vand.u32 127, %v220_v19  ;;  %p345_p0 = scmp.ne.s32.totalorder %s534_s14, 1 }
  0x2b   : > { %416 = vlog2.f32 %v197_v2 }
  0x2c   : > { %418 = vlog2.f32 %v198_v4 }
  0x2e   : > { %v203_v6 = vstv %s194_s18  ;;  %v210_v23 = vld [vmem:[#allocation2] sm:$0x3] }
  0x31   : > { %v417_v5 = vpop.eup %416 }
  0x32   : > { %v419_v7 = vpop.eup %418  ;;  %v200_v8 = vmul.f32 0.6931472, %v417_v5 }
  0x33   : > { %v202_v9 = vmul.f32 0.6931472, %v419_v7 }
  0x34   : > { %v204_v10 = vmul.f32 %v203_v6, %v200_v8 }
  0x35   : > { %v205_v11 = vmul.f32 %v203_v6, %v202_v9 }
  0x36   : > { %v206_v12 = vmul.f32 1.442695, %v204_v10 }
  0x37   : > { %v208_v13 = vmul.f32 1.442695, %v205_v11 }
  0x38   : > { %420 = vpow2.f32 %v206_v12 }
  0x39   : > { %422 = vpow2.f32 %v208_v13 }
  0x3e   : > { %v421_v14 = vpop.eup %420 }
  0x3f   : > { %v212_v15 = vsel %vm211_vm1, %v421_v14, 0.0  ;;  %v423_v16 = vpop.eup %422 }
  0x40   : > { %213 = vadd.xlane.f32.xlu0 %v212_v15  ;;  %v215_v17 = vsel %vm211_vm1, %v423_v16, 0.0 }
  0x48   : > { %216 = vadd.xlane.f32.xlu0 %v215_v17 }
  0xb3   : > { %v214_v18 = vpop.xlane.xlu0 %213 }
  0xb4   : > { %v222_v22 = vperm.slane %v214_v18, %v221_v20 }
  0xbb   : > { %v217_v21 = vpop.xlane.xlu0 %216 }
  0xbc   : > { %v223_v24 = vperm.slane %v217_v21, %v221_v20 }
  0xbd   : > { %233 = sbr.rel (%p345_p0) target bundleno = 224 (0xe0), region = 40 }
  0xbe   : > { %v225_v25 = vsel %vm224_vm2, %v223_v24, %v222_v22 }
  0xbf   : > { %v227_v26 = vadd.f32 %v225_v25, %v210_v23 }
  0xc1   : > { %229 = vst.msk [vmem:[#allocation2] sm:$0x3] %vm228_vm3, %v227_v26 }
  0xc2   : > { %424 = vrcp.f32 %v203_v6  ;;  %v249_v31 = vand.u32 2147483648, %v203_v6  ;;  %vm243_vm4 = vweird.f32 %v203_v6  ;;  %v247_v33 = vand.u32 2147483647, %v203_v6 }
  0xc4   : > { %v250_v36 = vor.u32 1.1754944e-38, %v249_v31  ;;  %vm248_vm7 = vcmp.eq.f32.partialorder %v247_v33, 8.507059e+37 }
  0xc8   : > { %v234_v27 = vld [vmem:[#allocation2] sm:$0x3]  ;;  %v425_v29 = vpop.eup %424 }
  0xc9   : > { %v235_v28 = vmul.f32 0.00390625, %v234_v27  ;;  %v239_v30 = vmul.f32 %v425_v29, %v203_v6  ;;  %vm244_vm5 = vweird.f32 %v425_v29 }
  0xca   : > { %vm245_vm6 = vmor %vm243_vm4, %vm244_vm5 }
  0xcb   : > { %426 = vlog2.f32 %v235_v28  ;;  %v240_v32 = vsub.f32 1.0, %v239_v30 }
  0xcd   : > { %v241_v35 = vmul.f32 %v425_v29, %v240_v32 }
  0xcf   : > { %v242_v38 = vadd.f32 %v425_v29, %v241_v35 }
  0xd1   : > { %v427_v34 = vpop.eup %426  ;;  %v246_v39 = vsel %vm245_vm6, %v425_v29, %v242_v38 }
  0xd2   : > { %v237_v37 = vmul.f32 0.6931472, %v427_v34  ;;  %v251_v40 = vsel %vm248_vm7, %v250_v36, %v246_v39 }
  0xd4   : > { %v252_v41 = vmul.f32 %v251_v40, %v237_v37 }
  0xd6   : > { %v253_v42 = vmul.f32 1.442695, %v252_v41 }
  0xd8   : > { %428 = vpow2.f32 %v253_v42 }
  0xde   : > { %v429_v43 = vpop.eup %428 }
  0xdf   : > { %255 = vst.msk [vmem:[#allocation7] sm:$0x3] %vm228_vm3, %v429_v43 }
  0xe0 PF: > { %p361_p1 = scmp.eq.s32.totalorder %s337_s0, 1  ;;  %s267_s20 = sshll.u32 %s663_s2, 4  ;;  %s268_s20 = int_to_ptr.hbm [resolvable:$true] %s267_s20 }
  0xe1   : > { %s548_s21 = smov [#allocation7]  }
  0xe2   : > { %s265_s23 = sshll.u32 %s548_s21, 4  ;;  %s266_s23 = int_to_ptr.vmem [resolvable:$true] %s265_s23 }
  0xe3   : > { %353 = dma.vmem_to_hbm [thread:$0]  (%p361_p1), %s266_s23, 32, %s268_s20, [#allocation6]  }
  0xe4   : > { %517 = dma.done.wait (%p361_p1), [#allocation6], 32  }
  0xe5   : > { %519 = vsyncadd (%p361_p1), [#allocation6], 4294967264 }
  0xe6 PF: > { %s17_s16 = sadd.s32 1, %s542_s16   ;;  %s666_s11 = smov %s526_s12 }
  0xe7   : > { %p14_p2 = scmp.ge.s32.totalorder %s17_s16, 4   ;;  %s667_s12 = smov %s530_s13 }
  0xe8   : > { %s668_s13 = smov %s618_s22  ;;  %s669_s14 = smov %s538_s15 }
  0xe9   : > { %s670_s15 = smov %s672_s17  ;;  %16 = sbr.rel (!%p14_p2) target bundleno = 7 (0x7), region = 74 }
  0xee   :  { %281 = vsyncpa [#allocation5], 1 }
  0xef   :  { %283 = vsyncpa [#allocation5 + $0x1], 1 }
  0xf0   :  { %284 = vsyncpa [#allocation6], 1 }
  0xf1   :  { %286 = vsyncpa [#allocation6 + $0x1], 1 }

</bundles_post_ra>
